<compile_context>
chip_gen: v7x
topology: tpu7x:2x2x1
jax: 0.10.0
libtpu: 0.0.40
codegen_flags: <defaults>
</compile_context>

<pallas_src>
import jax
import jax.numpy as jnp
from jax.experimental import pallas as pl
from jax.experimental.pallas import tpu as pltpu

_LANES = 1024       # lane-dense last dim, large multiple of 128 -> unmasked full-width stores
_BLOCK_ROWS = 512   # (512, 1024) f32 block = 2 MiB; double-buffered in+out << 32 MiB scoped VMEM


def _sigmoid_kernel(params_ref, x_ref, o_ref):
    # params_ref lives in SMEM: [bias, scale] with scale = exp(-temp) precomputed
    # in the wrapper (removes per-element divide and in-kernel transcendental).
    bias = params_ref[0]
    scale = params_ref[1]
    z = (x_ref[...] - bias) * scale
    # sigmoid(z) == 0.5 * (tanh(z/2) + 1): one EUP push per element instead of two.
    o_ref[...] = (0.5 * (jnp.tanh(0.5 * z) + 1.0)).astype(o_ref.dtype)


def sigmoid_module_forward(x, temp, bias):
    """Applies y = sigmoid((x - bias) / exp(temp)) elementwise via a tiled Pallas kernel.

    x: any-shape float array; temp, bias: scalars (module parameters).
    """
    orig_shape = x.shape
    dtype = x.dtype
    total = x.size

    flat = x.reshape(-1)

    # Flatten to a lane-dense 2D slab (rows, _LANES). Pad so rows is either the
    # whole (small) array in one block, or a multiple of _BLOCK_ROWS for tiling.
    rows = pl.cdiv(total, _LANES)
    if rows > _BLOCK_ROWS:
        rows = pl.cdiv(rows, _BLOCK_ROWS) * _BLOCK_ROWS
        block_rows = _BLOCK_ROWS
    else:
        block_rows = rows  # single block equal to full array dims (allowed)
    padded = rows * _LANES
    if padded != total:
        flat = jnp.pad(flat, (0, padded - total))
    x2d = flat.reshape(rows, _LANES)

    # Scalars in SMEM: [bias, exp(-temp)].
    scale = jnp.exp(-jnp.asarray(temp, dtype=jnp.float32))
    params = jnp.array([bias, scale], dtype=jnp.float32)

    grid = (rows // block_rows,)

    out2d = pl.pallas_call(
        _sigmoid_kernel,
        out_shape=jax.ShapeDtypeStruct((rows, _LANES), dtype),
        grid=grid,
        in_specs=[
            pl.BlockSpec(memory_space=pltpu.MemorySpace.SMEM),     # params (untiled scalars)
            pl.BlockSpec((block_rows, _LANES), lambda i: (i, 0)),  # x tile
        ],
        out_specs=pl.BlockSpec((block_rows, _LANES), lambda i: (i, 0)),
        compiler_params=pltpu.CompilerParams(
            dimension_semantics=("parallel",),  # embarrassingly parallel; v7x can use both TCs
        ),
    )(params, x2d)

    return out2d.reshape(-1)[:total].reshape(orig_shape)


if __name__ == "__main__":
    # Deterministic parameters matching Sigmoid_module(temp=1, bias=0.5)
    temp = 1.0
    bias = 0.5

    key = jax.random.PRNGKey(0)
    x = jax.random.normal(key, (2, 4, 16, 16), dtype=jnp.float32)

    y = sigmoid_module_forward(x, temp, bias)
    y = jax.block_until_ready(y)

    # Reference check in plain JAX (same math as the PyTorch forward).
    y_ref = jax.nn.sigmoid((x - bias) / jnp.exp(jnp.float32(temp)))
    assert y.shape == x.shape and y.dtype == x.dtype
    assert jnp.allclose(y, y_ref, atol=1e-5, rtol=1e-5)

    print("KERNEL_OK")
</pallas_src>

<mosaic_0001>
module attributes {stable_mosaic.version = 11 : i64} {
  func.func @_sigmoid_kernel(%arg0: i32, %arg1: memref<2xf32, #tpu.memory_space<smem>>, %arg2: memref<2x1024xf32, #tpu.memory_space<vmem>>, %arg3: memref<2x1024xf32, #tpu.memory_space<vmem>>) attributes {dimension_semantics = [#tpu.dimension_semantics<parallel>], iteration_bounds = array<i64: 1>, scalar_prefetch = 0 : i64, scratch_operands = 0 : i64, tpu.core_type = #tpu.core_type<tc>, window_params = [{transform_indices = @transform_0, window_bounds = array<i64: 2>}, {transform_indices = @transform_1, window_bounds = array<i64: 2, 1024>}, {transform_indices = @transform_2, window_bounds = array<i64: 2, 1024>}]} {
    %c0 = arith.constant 0 : index
    %0 = memref.load %arg1[%c0] : memref<2xf32, #tpu.memory_space<smem>>
    %c1 = arith.constant 1 : index
    %1 = memref.load %arg1[%c1] : memref<2xf32, #tpu.memory_space<smem>>
    %c0_0 = arith.constant 0 : index
    %c0_1 = arith.constant 0 : index
    %2 = vector.load %arg2[%c0_0, %c0_1] : memref<2x1024xf32, #tpu.memory_space<vmem>>, vector<2x1024xf32>
    %3 = vector.broadcast %0 : f32 to vector<2x1024xf32>
    %4 = arith.subf %2, %3 : vector<2x1024xf32>
    %5 = vector.broadcast %1 : f32 to vector<2x1024xf32>
    %6 = arith.mulf %4, %5 : vector<2x1024xf32>
    %cst = arith.constant 5.000000e-01 : f32
    %7 = vector.broadcast %cst : f32 to vector<2x1024xf32>
    %8 = arith.mulf %7, %6 : vector<2x1024xf32>
    %9 = math.tanh %8 : vector<2x1024xf32>
    %cst_2 = arith.constant 1.000000e+00 : f32
    %10 = vector.broadcast %cst_2 : f32 to vector<2x1024xf32>
    %11 = arith.addf %9, %10 : vector<2x1024xf32>
    %cst_3 = arith.constant 5.000000e-01 : f32
    %12 = vector.broadcast %cst_3 : f32 to vector<2x1024xf32>
    %13 = arith.mulf %12, %11 : vector<2x1024xf32>
    %c0_4 = arith.constant 0 : index
    %c0_5 = arith.constant 0 : index
    %14 = vector.load %arg3[%c0_4, %c0_5] : memref<2x1024xf32, #tpu.memory_space<vmem>>, vector<2x1024xf32>
    tpu.vector_store %arg3[%c0_4, %c0_5], %13 {strides = array<i32>} : memref<2x1024xf32, #tpu.memory_space<vmem>>, vector<2x1024xf32>,
    return
  }
  func.func @transform_0(%arg0: i32) -> i32 {
    %c0_i32 = arith.constant 0 : i32
    %c0_i32_0 = arith.constant 0 : i32
    return %c0_i32 : i32
  }
  func.func @transform_1(%arg0: i32) -> (i32, i32) {
    %c0_i32 = arith.constant 0 : i32
    %c0_i32_0 = arith.constant 0 : i32
    return %arg0, %c0_i32 : i32, i32
  }
  func.func @transform_2(%arg0: i32) -> (i32, i32) {
    %c0_i32 = arith.constant 0 : i32
    %c0_i32_0 = arith.constant 0 : i32
    return %arg0, %c0_i32 : i32, i32
  }
}

</mosaic_0001>

<bundles_post_ra>
// kernel: tpu_custom_call.1
= control target key start
LH: loop header
LB: loop body
LE: loop exit
PB: predicated region body
PF: predicated region fallthrough
CT: control target
= control target key end

     0   :  { %7 = vsyncpa [#allocation5], 0  ;;  %s193_s0 = inlined_call_operand.hbm [shape: f32[2], index: 0, kind: input, shape index: {}]   ;;  %s194_s1 = inlined_call_operand.hbm [shape: f32[2,1024], index: 1, kind: input, shape index: {}]   ;;  %s195_s2 = inlined_call_operand.hbm [shape: f32[2,1024], index: 2, kind: output, shape index: {}]  }
   0x1   :  { %8 = vsyncpa [#allocation3], 0 }
   0x2   :  { %9 = vsyncpa [#allocation4], 0  ;;  %s79_s11 = scalar_lea.hbm %s193_s0, 16 }
   0x3   :  { %p80_p0 = scmp.ne.s32.totalorder %s193_s0, %s79_s11  ;;  %p83_p1 = scmp.lt.u32.totalorder %s79_s11, %s193_s0 }
   0x5   :  { %p85_p2 = pnand %p83_p1, %p80_p0 }
   0x7   :  { %88 = shalt.err (!%p85_p2)
}
   0x8   :  { %s139_s16 = smov [#allocation2]   ;;  %s140_s19 = smov [#allocation6]  }
   0x9   :  { %17 = dma.hbm_to_smem %s193_s0, 16, %s139_s16, [#allocation5]  }
   0xa   :  { %s24_s20 = sshll.u32 %s140_s19, 4  ;;  %s89_s23 = scalar_lea.hbm %s194_s1, 256  ;;  %s25_s20 = int_to_ptr.vmem [resolvable:$true] %s24_s20 }
   0xb   :  { %p90_p3 = scmp.ne.s32.totalorder %s194_s1, %s89_s23  ;;  %p93_p4 = scmp.lt.u32.totalorder %s89_s23, %s194_s1 }
   0xd   :  { %p95_p5 = pnand %p93_p4, %p90_p3 }
   0xf   :  { %98 = shalt.err (!%p95_p5)
}
  0x10   :  { %s99_s28 = scalar_lea.vmem %s25_s20, 256  ;;  %p104_p7 = scmp.lt.s32.totalorder %s25_s20, %s25_s20 }
  0x11   :  { %p100_p6 = scmp.ne.s32.totalorder %s25_s20, %s99_s28  ;;  %p105_p8 = scmp.lt.s32.totalorder %s99_s28, %s99_s28 }
  0x13   :  { %p106_p9 = por %p105_p8, %p104_p7 }
  0x15   :  { %p107_p10 = pnand %p106_p9, %p100_p6 }
  0x17   :  { %110 = shalt.err (!%p107_p10)
}
  0x18   :  { %27 = dma.hbm_to_vmem [thread:$0]  %s194_s1, 256, %s25_s20, [#allocation3]  }
  0x19   :  { %133 = dma.done.wait [#allocation5], 16  }
  0x1a   :  { %134 = vsyncadd [#allocation5], 4294967280 }
  0x1b   :  { %135 = dma.done.wait [#allocation3], 256  }
  0x1c   :  { %136 = vsyncadd [#allocation3], 4294967040 }
  0x1d   :  { %34 = sfence }
  0x1e   :  { %s35_s30 = sld [smem:[#allocation2]]  ;;  %s71_s3 = sld [smem:[#allocation2 + $0x1]]  ;;  %v37_v0 = vld [vmem:[#allocation6] sm:$0xff]  ;;  %v38_v1 = vld [vmem:[#allocation6 + $0x8] sm:$0xff] }
  0x1f   :  { %s141_s1 = smov [#allocation7]  }
  0x20   :  { %s61_s4 = sshll.u32 %s141_s1, 4  ;;  %s62_s4 = int_to_ptr.vmem [resolvable:$true] %s61_s4 }
  0x21   :  { %s111_s5 = scalar_lea.vmem %s62_s4, 256  ;;  %p116_p12 = scmp.lt.s32.totalorder %s62_s4, %s62_s4 }
  0x22   :  { %p112_p11 = scmp.ne.s32.totalorder %s62_s4, %s111_s5  ;;  %p117_p13 = scmp.lt.s32.totalorder %s111_s5, %s111_s5 }
  0x24   :  { %v39_v2 = vstv %s35_s30  ;;  %v42_v3 = vstv %s71_s3  ;;  %p118_p0 = por %p117_p13, %p116_p12 }
  0x25   :  { %v40_v4 = vsub.f32 %v37_v0, %v39_v2  ;;  %v41_v5 = vsub.f32 %v38_v1, %v39_v2 }
  0x26   :  { %p119_p1 = pnand %p118_p0, %p112_p11 }
  0x27   :  { %v43_v6 = vmul.f32 %v42_v3, %v40_v4  ;;  %v44_v7 = vmul.f32 %v42_v3, %v41_v5 }
  0x29   :  { %v45_v8 = vmul.f32 0.5, %v43_v6  ;;  %v46_v9 = vmul.f32 0.5, %v44_v7 }
  0x2b   :  { %75 = vtanh.f32 %v45_v8 }
  0x2c   :  { %77 = vtanh.f32 %v46_v9 }
  0x35   :  { %v76_v10 = vpop.eup %75 }
  0x36   :  { %v78_v11 = vpop.eup %77  ;;  %v49_v12 = vadd.f32 1.0, %v76_v10 }
  0x37   :  { %v50_v13 = vadd.f32 1.0, %v78_v11 }
  0x38   :  { %v51_v14 = vmul.f32 0.5, %v49_v12 }
  0x39   :  { %v52_v15 = vmul.f32 0.5, %v50_v13 }
  0x3a   :  { %53 = vst [vmem:[#allocation7] sm:$0xff] %v51_v14 }
  0x3b   :  { %54 = vst [vmem:[#allocation7 + $0x8] sm:$0xff] %v52_v15 }
  0x3c   :  { %122 = shalt.err (!%p119_p1)
}
  0x3d   :  { %s123_s8 = scalar_lea.hbm %s195_s2, 256 }
  0x3e   :  { %p124_p2 = scmp.ne.s32.totalorder %s195_s2, %s123_s8  ;;  %p127_p3 = scmp.lt.u32.totalorder %s123_s8, %s195_s2 }
  0x40   :  { %p129_p4 = pnand %p127_p3, %p124_p2 }
  0x42   :  { %132 = shalt.err (!%p129_p4)
}
  0x43   :  { %64 = dma.vmem_to_hbm [thread:$0]  %s62_s4, 256, %s195_s2, [#allocation4]  }
  0x44   :  { %137 = dma.done.wait [#allocation4], 256  }
  0x45   :  { %138 = vsyncadd [#allocation4], 4294967040 }
  0x46   :  { %68 = vsyncpa [#allocation3], 1 }
  0x47   :  { %69 = vsyncpa [#allocation4], 1 }
  0x48   :  { %70 = vsyncpa [#allocation5], 1 }

</bundles_post_ra>
